<compile_context>
chip_gen: v6e
topology: v6e:2x2x1
jax: 0.10.0
libtpu: 0.0.40
codegen_flags: <defaults>
</compile_context>

<pallas_src>
import math

import jax
import jax.numpy as jnp
from jax.experimental import pallas as pl
from jax.experimental.pallas import tpu as pltpu


def _copy_kernel(x_ref, o_ref):
    # Pure data movement: one lane-dense VMEM tile in, same tile out.
    o_ref[...] = x_ref[...]


def _resolve_view_size(total_elems, size):
    """Replicate torch.view size semantics, including a single -1."""
    size = tuple(int(s) for s in size)
    if size.count(-1) > 1:
        raise ValueError("only one dimension can be inferred (-1)")
    if -1 in size:
        known = 1
        for s in size:
            if s != -1:
                known *= s
        if known == 0 or total_elems % known != 0:
            raise ValueError(f"shape {size} is invalid for input of size {total_elems}")
        size = tuple(total_elems // known if s == -1 else s for s in size)
    if math.prod(size) != total_elems:
        raise ValueError(f"shape {size} is invalid for input of size {total_elems}")
    return size


_LANES = 128
# ~2 MiB of payload per block: ~85-86% of HBM roofline (vs ~63% at 256 KiB),
# and 2x(in)+2x(out) double-buffered blocks = ~8 MiB resident, which fits the
# scoped-VMEM defaults of v5e (16 MiB), v6e (32 MiB) and v7x (32 MiB).
_TARGET_BLOCK_BYTES = 2 * 1024 * 1024


def _pick_tile_rows(rows, itemsize):
    """Rows per block for the lane-aligned (rows, 128) slab, dtype-scaled."""
    tr = _TARGET_BLOCK_BYTES // (_LANES * itemsize)
    tr = max(8, (tr // 8) * 8)          # sublane aligned
    if rows <= tr:
        return rows                      # single block == full dim, always legal
    return tr                            # partial last block handled by Pallas


def _pick_tile_lanes(total, itemsize):
    """Lanes per block for the odd-count (1, total) slab.

    A (1, N) block pads to 8 sublanes in VMEM (8x raw bytes), so budget
    ~2 MiB of VMEM per block -> ~256 KiB of payload.
    """
    tl = (_TARGET_BLOCK_BYTES // 8) // itemsize
    tl = max(_LANES, (tl // _LANES) * _LANES)   # lane aligned
    if total <= tl:
        return total                     # single block == full dim, always legal
    return tl


def view_pallas(x, size):
    """Pallas implementation of View(size).forward(x) == x.view(size)."""
    total = int(x.size)
    out_shape = _resolve_view_size(total, size)

    if total == 0:
        # Nothing to copy; metadata-only reshape is exact.
        return x.reshape(out_shape)

    itemsize = jnp.dtype(x.dtype).itemsize
    cost = pl.CostEstimate(flops=0, transcendentals=0,
                           bytes_accessed=2 * total * itemsize)
    # TODO(synk): on v7x confirm in xprof that "parallel" shards the copy across
    # both TensorCores; if not, switch this axis to pltpu.CORE_PARALLEL.
    cparams = pltpu.CompilerParams(dimension_semantics=("parallel",))

    if total % _LANES == 0:
        # Lane-dense staging slab + 1-D tiled grid (DMA overlap, unmasked vst).
        rows = total // _LANES
        slab = (rows, _LANES)
        x_slab = x.reshape(slab)                      # metadata only
        tr = _pick_tile_rows(rows, itemsize)
        copied = pl.pallas_call(
            _copy_kernel,
            out_shape=jax.ShapeDtypeStruct(slab, x.dtype),
            grid=(pl.cdiv(rows, tr),),
            in_specs=[pl.BlockSpec((tr, _LANES), lambda i: (i, 0))],
            out_specs=pl.BlockSpec((tr, _LANES), lambda i: (i, 0)),
            compiler_params=cparams,
            cost_estimate=cost,
        )(x_slab)
    else:
        # Odd element count: tile the (1, total) slab along lanes so large
        # odd-sized inputs stay pipelined and within scoped VMEM.
        slab = (1, total)
        x_slab = x.reshape(slab)                      # metadata only
        tl = _pick_tile_lanes(total, itemsize)
        copied = pl.pallas_call(
            _copy_kernel,
            out_shape=jax.ShapeDtypeStruct(slab, x.dtype),
            grid=(pl.cdiv(total, tl),),
            in_specs=[pl.BlockSpec((1, tl), lambda i: (0, i))],
            out_specs=pl.BlockSpec((1, tl), lambda i: (0, i)),
            compiler_params=cparams,
            cost_estimate=cost,
        )(x_slab)

    return copied.reshape(out_shape)                  # metadata only


if __name__ == "__main__":
    k0, k1 = jax.random.split(jax.random.PRNGKey(0))

    # NCHW input consistent with the MNIST generator usage: batch=2, C=4, 16x16.
    x = jax.random.normal(k0, (2, 4, 16, 16), dtype=jnp.float32)
    ref = x.reshape(2, 1024)                          # torch .view semantics

    out = view_pallas(x, (-1, 4 * 16 * 16))
    out = jax.block_until_ready(out)
    assert out.shape == (2, 1024), out.shape
    assert out.dtype == x.dtype
    assert bool(jnp.array_equal(out, ref))

    # Exercise the odd-element-count (lane-tiled) path as well.
    y = jax.random.normal(k1, (2, 3, 5), dtype=jnp.float32)
    out2 = jax.block_until_ready(view_pallas(y, (-1,)))
    assert out2.shape == (30,), out2.shape
    assert bool(jnp.array_equal(out2, y.reshape(30)))

    # Narrow-dtype check (dtype-scaled tile rows).
    z = jax.random.normal(k0, (4, 8, 32), dtype=jnp.bfloat16)
    out3 = jax.block_until_ready(view_pallas(z, (4, -1)))
    assert out3.shape == (4, 256), out3.shape
    assert bool(jnp.array_equal(out3, z.reshape(4, 256)))

    print("KERNEL_OK")
</pallas_src>

<mosaic_0001>
module attributes {stable_mosaic.version = 11 : i64} {
  func.func @_copy_kernel(%arg0: i32, %arg1: memref<16x128xf32, #tpu.memory_space<vmem>>, %arg2: memref<16x128xf32, #tpu.memory_space<vmem>>) attributes {dimension_semantics = [#tpu.dimension_semantics<parallel>], iteration_bounds = array<i64: 1>, scalar_prefetch = 0 : i64, scratch_operands = 0 : i64, tpu.core_type = #tpu.core_type<tc>, window_params = [{transform_indices = @transform_0, window_bounds = array<i64: 16, 128>}, {transform_indices = @transform_1, window_bounds = array<i64: 16, 128>}]} {
    %c0 = arith.constant 0 : index
    %c0_0 = arith.constant 0 : index
    %0 = vector.load %arg1[%c0, %c0_0] : memref<16x128xf32, #tpu.memory_space<vmem>>, vector<16x128xf32>
    %c0_1 = arith.constant 0 : index
    %c0_2 = arith.constant 0 : index
    %1 = vector.load %arg2[%c0_1, %c0_2] : memref<16x128xf32, #tpu.memory_space<vmem>>, vector<16x128xf32>
    tpu.vector_store %arg2[%c0_1, %c0_2], %0 {strides = array<i32>} : memref<16x128xf32, #tpu.memory_space<vmem>>, vector<16x128xf32>,
    return
  }
  func.func @transform_0(%arg0: i32) -> (i32, i32) {
    %c0_i32 = arith.constant 0 : i32
    %c0_i32_0 = arith.constant 0 : i32
    return %arg0, %c0_i32 : i32, i32
  }
  func.func @transform_1(%arg0: i32) -> (i32, i32) {
    %c0_i32 = arith.constant 0 : i32
    %c0_i32_0 = arith.constant 0 : i32
    return %arg0, %c0_i32 : i32, i32
  }
}

</mosaic_0001>

<bundles_post_ra>
// kernel: tpu_custom_call.1
= control target key start
LH: loop header
LB: loop body
LE: loop exit
PB: predicated region body
PF: predicated region fallthrough
CT: control target
= control target key end

     0   :  { %6 = vsyncpa [#allocation3], 0  ;;  %s112_s0 = inlined_call_operand.hbm [shape: f32[16,128], index: 0, kind: input, shape index: {}]   ;;  %s113_s1 = inlined_call_operand.hbm [shape: f32[16,128], index: 1, kind: output, shape index: {}]  }
   0x1   :  { %7 = vsyncpa [#allocation4], 0  ;;  %s92_s6 = smov [#allocation2]  }
   0x2   :  { %s13_s7 = sshll.u32 %s92_s6, 4  ;;  %s14_s7 = int_to_ptr.vmem [resolvable:$true] %s13_s7 }
   0x3   :  { %s56_s8 = scalar_lea.vmem %s14_s7, 256  ;;  %p61_p1 = scmp.lt.s32.totalorder %s14_s7, %s14_s7 }
   0x4   :  { %p57_p0 = scmp.ne.s32.totalorder %s14_s7, %s56_s8  ;;  %p62_p2 = scmp.lt.s32.totalorder %s56_s8, %s56_s8 }
   0x6   :  { %p63_p3 = por %p62_p2, %p61_p1 }
   0x8   :  { %p64_p4 = pnand %p63_p3, %p57_p0 }
   0xa   :  { %67 = shalt.err (!%p64_p4)
}
   0xb   :  { %s93_s9 = smov 128   ;;  %s94_s10 = smov 8  }
   0xc   :  { %19 = dma.hbm_to_vmem [thread:$0]  %s112_s0, 256, %s14_s7, [#allocation3], %s93_s9, %s93_s9, %s94_s10  }
   0xd   :  { %88 = dma.done.wait [#allocation3], 256  }
   0xe   :  { %89 = vsyncadd [#allocation3], 4294967040  ;;  %s95_s13 = smov [#allocation5]   ;;  %v23_v0 = vld [vmem:[#allocation2] sm:$0xff]  ;;  %v24_v1 = vld [vmem:[#allocation2 + $0x8] sm:$0xff] }
   0xf   :  { %s32_s14 = sshll.u32 %s95_s13, 4  ;;  %25 = vst [vmem:[#allocation5] sm:$0xff] %v23_v0  ;;  %26 = vst [vmem:[#allocation5 + $0x8] sm:$0xff] %v24_v1  ;;  %s33_s14 = int_to_ptr.vmem [resolvable:$true] %s32_s14 }
  0x10   :  { %s68_s15 = scalar_lea.vmem %s33_s14, 256  ;;  %p73_p6 = scmp.lt.s32.totalorder %s33_s14, %s33_s14 }
  0x11   :  { %p69_p5 = scmp.ne.s32.totalorder %s33_s14, %s68_s15  ;;  %p74_p7 = scmp.lt.s32.totalorder %s68_s15, %s68_s15 }
  0x13   :  { %p75_p8 = por %p74_p7, %p73_p6 }
  0x15   :  { %p76_p9 = pnand %p75_p8, %p69_p5 }
  0x17   :  { %79 = shalt.err (!%p76_p9)
}
  0x18   :  { %38 = dma.vmem_to_hbm [thread:$0]  %s33_s14, 256, %s113_s1, [#allocation4], %s93_s9, %s93_s9, %s94_s10  }
  0x19   :  { %90 = dma.done.wait [#allocation4], 256  }
  0x1a   :  { %91 = vsyncadd [#allocation4], 4294967040 }
  0x1b   :  { %42 = vsyncpa [#allocation3], 1 }
  0x1c   :  { %43 = vsyncpa [#allocation4], 1 }

</bundles_post_ra>
